<compile_context>
chip_gen: v5e
topology: v5e:2x2
jax: 0.10.0
libtpu: 0.0.40
codegen_flags: <defaults>
</compile_context>

<pallas_src>
import math

import jax
import jax.numpy as jnp
from jax.experimental import pallas as pl
from jax.experimental.pallas import tpu as pltpu

LANE = 128      # vreg lane width
SUBLANE = 8     # f32 sublane count


def _round_up(x, m):
    return (x + m - 1) // m * m


def _make_fc_kernel(activations):
    """Fused multi-layer (matmul + bias + activation) kernel body.

    `activations` is static, so the layer loop fully unrolls at trace time.
    Refs arrive as: x_ref, w0, b0, w1, b1, ..., o_ref.  The intermediate
    activation `h` never leaves VMEM/vregs between layers.
    """
    num_layers = len(activations)

    def kernel(x_ref, *rest):
        o_ref = rest[-1]
        h = x_ref[...].astype(jnp.float32)
        for li in range(num_layers):
            w = rest[2 * li][...]
            b = rest[2 * li + 1][...]          # (1, N): broadcasts over rows
            h = jnp.dot(h, w, preferred_element_type=jnp.float32) + b
            act = activations[li]
            if act == "relu":
                h = jnp.maximum(h, 0.0)
            elif act == "tanh":
                h = jnp.tanh(h)
        o_ref[...] = h.astype(o_ref.dtype)

    return kernel


def _choose_row_tiling(M, tm_cap):
    """Pick (tm, grid, m_pad) so that:
       * tm is a multiple of 8 and <= tm_cap,
       * the grid has >= 2 steps whenever M > 8 (engages v7x's 2nd TC),
       * m_pad = tm * grid divides round_up(M, 8) tightly (low pad waste)."""
    m8 = _round_up(max(M, 1), SUBLANE)
    g = max(min(2, m8 // SUBLANE), pl.cdiv(m8, tm_cap))
    tm = _round_up(pl.cdiv(m8, g), SUBLANE)
    g = pl.cdiv(m8, tm)
    return tm, g, tm * g


def fc_forward(x2d, padded_params, activations, *, tm_cap=512):
    """Run the whole FC stack in one pallas_call, tiled over rows.

    x2d:           (M, K0p) f32, K0p already a multiple of 128.
    padded_params: list of (W, b) with W (K_i, N_i), b (N_i,), all feature
                   dims multiples of 128 (zero-padded).
    """
    M, k0p = x2d.shape
    noutp = padded_params[-1][0].shape[1]

    # --- VMEM-aware tile selection (v7x has only 64 MiB per TC) -----------
    weight_bytes = sum(w.size * 4 + w.shape[1] * 4 for (w, _) in padded_params)
    max_n = max([k0p, noutp]
                + [w.shape[0] for (w, _) in padded_params]
                + [w.shape[1] for (w, _) in padded_params])

    def streaming_bytes(t):
        # double-buffered x/out tiles + live intermediate activations
        return 4 * t * (2 * k0p + 2 * noutp + 2 * max_n)

    budget = 40 << 20   # conservative: fits v7x 64 MiB with headroom
    while tm_cap > SUBLANE and weight_bytes + streaming_bytes(tm_cap) > budget:
        tm_cap //= 2
    tm_cap = max(tm_cap, SUBLANE)
    # TODO(synk): if weights alone exceed the budget, tile the widest layer
    # over an extra 'arbitrary' grid axis instead of full-array weight blocks.

    tm, grid_m, m_pad = _choose_row_tiling(M, tm_cap)
    if m_pad != M:
        x2d = jnp.pad(x2d, ((0, m_pad - M), (0, 0)))

    flat_inputs = [x2d]
    for (w, b) in padded_params:
        flat_inputs.append(w)
        flat_inputs.append(b.reshape(1, b.shape[0]))

    vmem_limit = int(min(max(2 * (weight_bytes + streaming_bytes(tm)), 16 << 20),
                         64 << 20))

    # Advisory cost estimate for XLA's scheduler.
    flops = 2 * m_pad * sum(w.shape[0] * w.shape[1] for (w, _) in padded_params)
    transcendentals = sum(m_pad * w.shape[1]
                          for (w, _), act in zip(padded_params, activations)
                          if act == "tanh")
    bytes_accessed = 4 * (m_pad * k0p + m_pad * noutp
                          + sum(w.size + w.shape[1] for (w, _) in padded_params))

    def run(weight_mode):
        in_specs = [pl.BlockSpec((tm, k0p), lambda i: (i, 0))]
        for (w, _) in padded_params:
            kp, np_ = w.shape
            # Weights/biases are reused by every row tile: full-array blocks,
            # constant index_map, single-buffered when supported.
            in_specs.append(pl.BlockSpec((kp, np_), lambda i: (0, 0),
                                         pipeline_mode=weight_mode))
            in_specs.append(pl.BlockSpec((1, np_), lambda i: (0, 0),
                                         pipeline_mode=weight_mode))
        return pl.pallas_call(
            _make_fc_kernel(tuple(activations)),
            out_shape=jax.ShapeDtypeStruct((m_pad, noutp), x2d.dtype),
            grid=(grid_m,),
            in_specs=in_specs,
            out_specs=pl.BlockSpec((tm, noutp), lambda i: (i, 0)),
            compiler_params=pltpu.CompilerParams(
                # Row tiles are independent -> shard across v7x's 2 TCs.
                dimension_semantics=("parallel",),
                vmem_limit_bytes=vmem_limit,
            ),
            cost_estimate=pl.CostEstimate(
                flops=flops,
                transcendentals=transcendentals,
                bytes_accessed=bytes_accessed,
            ),
        )(*flat_inputs)

    try:
        out = run(pl.Buffered(1))
    except Exception:
        # Fallback for jax versions where Buffered(1) is unavailable/rejected.
        out = run(None)

    return out[:M] if m_pad != M else out


class FCPallas:
    """JAX/Pallas port of the PyTorch FC module (single fused kernel)."""

    def __init__(self, units, activations, key):
        assert len(units) == len(activations)
        self.activations = list(activations)
        self.params = []         # unpadded (pure-JAX reference)
        self.padded_params = []  # 128-lane zero-padded (kernel)
        for (u_in, u_out) in units:
            key, kw, kb = jax.random.split(key, 3)
            # Deterministic init mimicking nn.Linear's U(-1/sqrt(in), 1/sqrt(in)).
            bound = 1.0 / math.sqrt(u_in)
            w = jax.random.uniform(kw, (u_in, u_out), minval=-bound,
                                   maxval=bound, dtype=jnp.float32)
            b = jax.random.uniform(kb, (u_out,), minval=-bound,
                                   maxval=bound, dtype=jnp.float32)
            self.params.append((w, b))
            # Zero-pad feature dims to 128-lane multiples.  Bit-exact: padded
            # bias entries and the next layer's padded weight rows are zero,
            # and relu(0)=tanh(0)=0, so padded columns contribute nothing.
            kp, np_ = _round_up(u_in, LANE), _round_up(u_out, LANE)
            wp = jnp.zeros((kp, np_), jnp.float32).at[:u_in, :u_out].set(w)
            bp = jnp.zeros((np_,), jnp.float32).at[:u_out].set(b)
            self.padded_params.append((wp, bp))
        self.k0 = units[0][0]
        self.k0_pad = _round_up(self.k0, LANE)
        self.n_out = units[-1][1]

    def __call__(self, x):
        lead = x.shape[:-1]
        h = x.reshape(-1, x.shape[-1]).astype(jnp.float32)
        if self.k0_pad != self.k0:
            h = jnp.pad(h, ((0, 0), (0, self.k0_pad - self.k0)))
        h = fc_forward(h, self.padded_params, self.activations)
        h = h[:, : self.n_out]          # drop lane-padding columns
        return h.reshape(*lead, self.n_out)

    def reference(self, x):
        """Pure-JAX reference for correctness checking (unpadded params)."""
        h = x
        for (w, b), act in zip(self.params, self.activations):
            h = jnp.dot(h, w) + b
            if act == "relu":
                h = jnp.maximum(h, 0.0)
            elif act == "tanh":
                h = jnp.tanh(h)
        return h


if __name__ == "__main__":
    key = jax.random.PRNGKey(0)
    key, xkey, pkey = jax.random.split(key, 3)

    # Small shapes consistent with the module: batch=2, seq=8, features=16.
    units = [(16, 32), (32, 32), (32, 8)]
    activations = ["relu", "tanh", None]

    x = jax.random.normal(xkey, (2, 8, 16), dtype=jnp.float32)

    fc = FCPallas(units, activations, pkey)

    out = fc(x)
    out = jax.block_until_ready(out)

    ref = fc.reference(x)
    assert out.shape == (2, 8, 8), out.shape
    assert jnp.allclose(out, ref, atol=1e-5, rtol=1e-5), "mismatch vs reference"

    print("KERNEL_OK")
</pallas_src>

<mosaic_0001>
module attributes {stable_mosaic.version = 11 : i64} {
  func.func @kernel(%arg0: i32, %arg1: memref<8x128xf32, #tpu.memory_space<vmem>>, %arg2: memref<128x128xf32, #tpu.memory_space<vmem>>, %arg3: memref<1x128xf32, #tpu.memory_space<vmem>>, %arg4: memref<128x128xf32, #tpu.memory_space<vmem>>, %arg5: memref<1x128xf32, #tpu.memory_space<vmem>>, %arg6: memref<128x128xf32, #tpu.memory_space<vmem>>, %arg7: memref<1x128xf32, #tpu.memory_space<vmem>>, %arg8: memref<8x128xf32, #tpu.memory_space<vmem>>) attributes {dimension_semantics = [#tpu.dimension_semantics<parallel>], iteration_bounds = array<i64: 2>, scalar_prefetch = 0 : i64, scratch_operands = 0 : i64, tpu.core_type = #tpu.core_type<tc>, window_params = [{transform_indices = @transform_0, window_bounds = array<i64: 8, 128>}, {pipeline_mode = #tpu.pipeline_mode<synchronous>, transform_indices = @transform_1, window_bounds = array<i64: 128, 128>}, {pipeline_mode = #tpu.pipeline_mode<synchronous>, transform_indices = @transform_2, window_bounds = array<i64: 1, 128>}, {pipeline_mode = #tpu.pipeline_mode<synchronous>, transform_indices = @transform_3, window_bounds = array<i64: 128, 128>}, {pipeline_mode = #tpu.pipeline_mode<synchronous>, transform_indices = @transform_4, window_bounds = array<i64: 1, 128>}, {pipeline_mode = #tpu.pipeline_mode<synchronous>, transform_indices = @transform_5, window_bounds = array<i64: 128, 128>}, {pipeline_mode = #tpu.pipeline_mode<synchronous>, transform_indices = @transform_6, window_bounds = array<i64: 1, 128>}, {transform_indices = @transform_7, window_bounds = array<i64: 8, 128>}]} {
    %c0 = arith.constant 0 : index
    %c0_0 = arith.constant 0 : index
    %0 = vector.load %arg1[%c0, %c0_0] : memref<8x128xf32, #tpu.memory_space<vmem>>, vector<8x128xf32>
    %c0_1 = arith.constant 0 : index
    %c0_2 = arith.constant 0 : index
    %1 = vector.load %arg2[%c0_1, %c0_2] : memref<128x128xf32, #tpu.memory_space<vmem>>, vector<128x128xf32>
    %c0_3 = arith.constant 0 : index
    %c0_4 = arith.constant 0 : index
    %2 = vector.load %arg3[%c0_3, %c0_4] : memref<1x128xf32, #tpu.memory_space<vmem>>, vector<1x128xf32>
    %cst = arith.constant dense<0.000000e+00> : vector<8x128xf32>
    %3 = tpu.matmul %0, %1, %cst {dimension_numbers = #tpu.dot_dimension_numbers<[1], [0], [0], [1], [0, 0, 1, 1], [], []>} : vector<8x128xf32>, vector<128x128xf32>, vector<8x128xf32> -> vector<8x128xf32>
    %4 = vector.broadcast %2 : vector<1x128xf32> to vector<8x128xf32>
    %5 = arith.addf %3, %4 : vector<8x128xf32>
    %cst_5 = arith.constant 0.000000e+00 : f32
    %6 = vector.broadcast %cst_5 : f32 to vector<8x128xf32>
    %7 = arith.maximumf %5, %6 : vector<8x128xf32>
    %c0_6 = arith.constant 0 : index
    %c0_7 = arith.constant 0 : index
    %8 = vector.load %arg4[%c0_6, %c0_7] : memref<128x128xf32, #tpu.memory_space<vmem>>, vector<128x128xf32>
    %c0_8 = arith.constant 0 : index
    %c0_9 = arith.constant 0 : index
    %9 = vector.load %arg5[%c0_8, %c0_9] : memref<1x128xf32, #tpu.memory_space<vmem>>, vector<1x128xf32>
    %cst_10 = arith.constant dense<0.000000e+00> : vector<8x128xf32>
    %10 = tpu.matmul %7, %8, %cst_10 {dimension_numbers = #tpu.dot_dimension_numbers<[1], [0], [0], [1], [0, 0, 1, 1], [], []>} : vector<8x128xf32>, vector<128x128xf32>, vector<8x128xf32> -> vector<8x128xf32>
    %11 = vector.broadcast %9 : vector<1x128xf32> to vector<8x128xf32>
    %12 = arith.addf %10, %11 : vector<8x128xf32>
    %13 = math.tanh %12 : vector<8x128xf32>
    %c0_11 = arith.constant 0 : index
    %c0_12 = arith.constant 0 : index
    %14 = vector.load %arg6[%c0_11, %c0_12] : memref<128x128xf32, #tpu.memory_space<vmem>>, vector<128x128xf32>
    %c0_13 = arith.constant 0 : index
    %c0_14 = arith.constant 0 : index
    %15 = vector.load %arg7[%c0_13, %c0_14] : memref<1x128xf32, #tpu.memory_space<vmem>>, vector<1x128xf32>
    %cst_15 = arith.constant dense<0.000000e+00> : vector<8x128xf32>
    %16 = tpu.matmul %13, %14, %cst_15 {dimension_numbers = #tpu.dot_dimension_numbers<[1], [0], [0], [1], [0, 0, 1, 1], [], []>} : vector<8x128xf32>, vector<128x128xf32>, vector<8x128xf32> -> vector<8x128xf32>
    %17 = vector.broadcast %15 : vector<1x128xf32> to vector<8x128xf32>
    %18 = arith.addf %16, %17 : vector<8x128xf32>
    %c0_16 = arith.constant 0 : index
    %c0_17 = arith.constant 0 : index
    %19 = vector.load %arg8[%c0_16, %c0_17] : memref<8x128xf32, #tpu.memory_space<vmem>>, vector<8x128xf32>
    tpu.vector_store %arg8[%c0_16, %c0_17], %18 {strides = array<i32>} : memref<8x128xf32, #tpu.memory_space<vmem>>, vector<8x128xf32>,
    return
  }
  func.func @transform_0(%arg0: i32) -> (i32, i32) {
    %c0_i32 = arith.constant 0 : i32
    %c0_i32_0 = arith.constant 0 : i32
    return %arg0, %c0_i32 : i32, i32
  }
  func.func @transform_1(%arg0: i32) -> (i32, i32) {
    %c0_i32 = arith.constant 0 : i32
    %c0_i32_0 = arith.constant 0 : i32
    %c0_i32_1 = arith.constant 0 : i32
    return %c0_i32, %c0_i32_0 : i32, i32
  }
  func.func @transform_2(%arg0: i32) -> (i32, i32) {
    %c0_i32 = arith.constant 0 : i32
    %c0_i32_0 = arith.constant 0 : i32
    %c0_i32_1 = arith.constant 0 : i32
    return %c0_i32, %c0_i32_0 : i32, i32
  }
  func.func @transform_3(%arg0: i32) -> (i32, i32) {
    %c0_i32 = arith.constant 0 : i32
    %c0_i32_0 = arith.constant 0 : i32
    %c0_i32_1 = arith.constant 0 : i32
    return %c0_i32, %c0_i32_0 : i32, i32
  }
  func.func @transform_4(%arg0: i32) -> (i32, i32) {
    %c0_i32 = arith.constant 0 : i32
    %c0_i32_0 = arith.constant 0 : i32
    %c0_i32_1 = arith.constant 0 : i32
    return %c0_i32, %c0_i32_0 : i32, i32
  }
  func.func @transform_5(%arg0: i32) -> (i32, i32) {
    %c0_i32 = arith.constant 0 : i32
    %c0_i32_0 = arith.constant 0 : i32
    %c0_i32_1 = arith.constant 0 : i32
    return %c0_i32, %c0_i32_0 : i32, i32
  }
  func.func @transform_6(%arg0: i32) -> (i32, i32) {
    %c0_i32 = arith.constant 0 : i32
    %c0_i32_0 = arith.constant 0 : i32
    %c0_i32_1 = arith.constant 0 : i32
    return %c0_i32, %c0_i32_0 : i32, i32
  }
  func.func @transform_7(%arg0: i32) -> (i32, i32) {
    %c0_i32 = arith.constant 0 : i32
    %c0_i32_0 = arith.constant 0 : i32
    return %arg0, %c0_i32 : i32, i32
  }
}

module attributes {stable_mosaic.version = 11 : i64} {
  func.func @kernel(%arg0: i32, %arg1: memref<8x128xf32, #tpu.memory_space<vmem>>, %arg2: memref<128x128xf32, #tpu.memory_space<vmem>>, %arg3: memref<1x128xf32, #tpu.memory_space<vmem>>, %arg4: memref<128x128xf32, #tpu.memory_space<vmem>>, %arg5: memref<1x128xf32, #tpu.memory_space<vmem>>, %arg6: memref<128x128xf32, #tpu.memory_space<vmem>>, %arg7: memref<1x128xf32, #tpu.memory_space<vmem>>, %arg8: memref<8x128xf32, #tpu.memory_space<vmem>>) attributes {dimension_semantics = [#tpu.dimension_semantics<parallel>], iteration_bounds = array<i64: 2>, scalar_prefetch = 0 : i64, scratch_operands = 0 : i64, tpu.core_type = #tpu.core_type<tc>, window_params = [{transform_indices = @transform_0, window_bounds = array<i64: 8, 128>}, {pipeline_mode = #tpu.pipeline_mode<synchronous>, transform_indices = @transform_1, window_bounds = array<i64: 128, 128>}, {pipeline_mode = #tpu.pipeline_mode<synchronous>, transform_indices = @transform_2, window_bounds = array<i64: 1, 128>}, {pipeline_mode = #tpu.pipeline_mode<synchronous>, transform_indices = @transform_3, window_bounds = array<i64: 128, 128>}, {pipeline_mode = #tpu.pipeline_mode<synchronous>, transform_indices = @transform_4, window_bounds = array<i64: 1, 128>}, {pipeline_mode = #tpu.pipeline_mode<synchronous>, transform_indices = @transform_5, window_bounds = array<i64: 128, 128>}, {pipeline_mode = #tpu.pipeline_mode<synchronous>, transform_indices = @transform_6, window_bounds = array<i64: 1, 128>}, {transform_indices = @transform_7, window_bounds = array<i64: 8, 128>}]} {
    %c0 = arith.constant 0 : index
    %c0_0 = arith.constant 0 : index
    %0 = vector.load %arg1[%c0, %c0_0] : memref<8x128xf32, #tpu.memory_space<vmem>>, vector<8x128xf32>
    %c0_1 = arith.constant 0 : index
    %c0_2 = arith.constant 0 : index
    %1 = vector.load %arg2[%c0_1, %c0_2] : memref<128x128xf32, #tpu.memory_space<vmem>>, vector<128x128xf32>
    %c0_3 = arith.constant 0 : index
    %c0_4 = arith.constant 0 : index
    %2 = vector.load %arg3[%c0_3, %c0_4] : memref<1x128xf32, #tpu.memory_space<vmem>>, vector<1x128xf32>
    %cst = arith.constant dense<0.000000e+00> : vector<8x128xf32>
    %3 = tpu.matmul %0, %1, %cst {dimension_numbers = #tpu.dot_dimension_numbers<[1], [0], [0], [1], [0, 0, 1, 1], [], []>} : vector<8x128xf32>, vector<128x128xf32>, vector<8x128xf32> -> vector<8x128xf32>
    %4 = vector.broadcast %2 : vector<1x128xf32> to vector<8x128xf32>
    %5 = arith.addf %3, %4 : vector<8x128xf32>
    %cst_5 = arith.constant 0.000000e+00 : f32
    %6 = vector.broadcast %cst_5 : f32 to vector<8x128xf32>
    %7 = arith.maximumf %5, %6 : vector<8x128xf32>
    %c0_6 = arith.constant 0 : index
    %c0_7 = arith.constant 0 : index
    %8 = vector.load %arg4[%c0_6, %c0_7] : memref<128x128xf32, #tpu.memory_space<vmem>>, vector<128x128xf32>
    %c0_8 = arith.constant 0 : index
    %c0_9 = arith.constant 0 : index
    %9 = vector.load %arg5[%c0_8, %c0_9] : memref<1x128xf32, #tpu.memory_space<vmem>>, vector<1x128xf32>
    %cst_10 = arith.constant dense<0.000000e+00> : vector<8x128xf32>
    %10 = tpu.matmul %7, %8, %cst_10 {dimension_numbers = #tpu.dot_dimension_numbers<[1], [0], [0], [1], [0, 0, 1, 1], [], []>} : vector<8x128xf32>, vector<128x128xf32>, vector<8x128xf32> -> vector<8x128xf32>
    %11 = vector.broadcast %9 : vector<1x128xf32> to vector<8x128xf32>
    %12 = arith.addf %10, %11 : vector<8x128xf32>
    %13 = math.tanh %12 : vector<8x128xf32>
    %c0_11 = arith.constant 0 : index
    %c0_12 = arith.constant 0 : index
    %14 = vector.load %arg6[%c0_11, %c0_12] : memref<128x128xf32, #tpu.memory_space<vmem>>, vector<128x128xf32>
    %c0_13 = arith.constant 0 : index
    %c0_14 = arith.constant 0 : index
    %15 = vector.load %arg7[%c0_13, %c0_14] : memref<1x128xf32, #tpu.memory_space<vmem>>, vector<1x128xf32>
    %cst_15 = arith.constant dense<0.000000e+00> : vector<8x128xf32>
    %16 = tpu.matmul %13, %14, %cst_15 {dimension_numbers = #tpu.dot_dimension_numbers<[1], [0], [0], [1], [0, 0, 1, 1], [], []>} : vector<8x128xf32>, vector<128x128xf32>, vector<8x128xf32> -> vector<8x128xf32>
    %17 = vector.broadcast %15 : vector<1x128xf32> to vector<8x128xf32>
    %18 = arith.addf %16, %17 : vector<8x128xf32>
    %c0_16 = arith.constant 0 : index
    %c0_17 = arith.constant 0 : index
    %19 = vector.load %arg8[%c0_16, %c0_17] : memref<8x128xf32, #tpu.memory_space<vmem>>, vector<8x128xf32>
    tpu.vector_store %arg8[%c0_16, %c0_17], %18 {strides = array<i32>} : memref<8x128xf32, #tpu.memory_space<vmem>>, vector<8x128xf32>,
    return
  }
  func.func @transform_0(%arg0: i32) -> (i32, i32) {
    %c0_i32 = arith.constant 0 : i32
    %c0_i32_0 = arith.constant 0 : i32
    return %arg0, %c0_i32 : i32, i32
  }
  func.func @transform_1(%arg0: i32) -> (i32, i32) {
    %c0_i32 = arith.constant 0 : i32
    %c0_i32_0 = arith.constant 0 : i32
    %c0_i32_1 = arith.constant 0 : i32
    return %c0_i32, %c0_i32_0 : i32, i32
  }
  func.func @transform_2(%arg0: i32) -> (i32, i32) {
    %c0_i32 = arith.constant 0 : i32
    %c0_i32_0 = arith.constant 0 : i32
    %c0_i32_1 = arith.constant 0 : i32
    return %c0_i32, %c0_i32_0 : i32, i32
  }
  func.func @transform_3(%arg0: i32) -> (i32, i32) {
    %c0_i32 = arith.constant 0 : i32
    %c0_i32_0 = arith.constant 0 : i32
    %c0_i32_1 = arith.constant 0 : i32
    return %c0_i32, %c0_i32_0 : i32, i32
  }
  func.func @transform_4(%arg0: i32) -> (i32, i32) {
    %c0_i32 = arith.constant 0 : i32
    %c0_i32_0 = arith.constant 0 : i32
    %c0_i32_1 = arith.constant 0 : i32
    return %c0_i32, %c0_i32_0 : i32, i32
  }
  func.func @transform_5(%arg0: i32) -> (i32, i32) {
    %c0_i32 = arith.constant 0 : i32
    %c0_i32_0 = arith.constant 0 : i32
    %c0_i32_1 = arith.constant 0 : i32
    return %c0_i32, %c0_i32_0 : i32, i32
  }
  func.func @transform_6(%arg0: i32) -> (i32, i32) {
    %c0_i32 = arith.constant 0 : i32
    %c0_i32_0 = arith.constant 0 : i32
    %c0_i32_1 = arith.constant 0 : i32
    return %c0_i32, %c0_i32_0 : i32, i32
  }
  func.func @transform_7(%arg0: i32) -> (i32, i32) {
    %c0_i32 = arith.constant 0 : i32
    %c0_i32_0 = arith.constant 0 : i32
    return %arg0, %c0_i32 : i32, i32
  }
}

</mosaic_0001>

<bundles_post_ra>
// kernel: tpu_custom_call.1
= control target key start
LH: loop header
LB: loop body
LE: loop exit
PB: predicated region body
PF: predicated region fallthrough
CT: control target
= control target key end

     0   :  { %s1100_s0 = inlined_call_operand.hbm [shape: f32[16,128], index: 0, kind: input, shape index: {}]   ;;  %s1101_s1 = inlined_call_operand.hbm [shape: f32[128,128], index: 1, kind: input, shape index: {}]   ;;  %s1102_s2 = inlined_call_operand.vmem [shape: f32[1,128], index: 2, kind: input, shape index: {}]   ;;  %s1103_s3 = inlined_call_operand.hbm [shape: f32[128,128], index: 3, kind: input, shape index: {}]   ;;  %s1104_s4 = inlined_call_operand.vmem [shape: f32[1,128], index: 4, kind: input, shape index: {}]   ;;  %s1105_s5 = inlined_call_operand.hbm [shape: f32[128,128], index: 5, kind: input, shape index: {}]   ;;  %s1106_s6 = inlined_call_operand.vmem [shape: f32[1,128], index: 6, kind: input, shape index: {}]   ;;  %s1107_s7 = inlined_call_operand.hbm [shape: f32[16,128], index: 7, kind: output, shape index: {}]  }
   0x1   :  { %1108 = sst [smem:[#allocation15_spill]] %s1101_s1 }
   0x2   :  { %12 = vsyncpa [#allocation3], 0 }
   0x3   :  { %14 = vsyncpa [#allocation3 + $0x1], 0 }
   0x4   :  { %15 = vsyncpa [#allocation6], 0 }
   0x5   :  { %16 = vsyncpa [#allocation9], 0 }
   0x6   :  { %17 = vsyncpa [#allocation4], 0 }
   0x7   :  { %19 = vsyncpa [#allocation4 + $0x1], 0  ;;  %s928_s24 = smov 0   ;;  %s930_s25 = smov 0  }
   0x8   :  { %s932_s26 = smov 0   ;;  %s934_s27 = smov 0  }
   0x9 LB: > { %s1109_s1 = sld [smem:[#allocation15_spill]]  ;;  %s952_s8 = sadd.s32 4294967295, %s881_s27   ;;  %s881_s27 = sphi %s934_s27, %s1120_s27   ;;  %s877_s26 = sphi %s932_s26, %s1119_s26   ;;  %s873_s25 = sphi %s930_s25, %s1118_s25   ;;  %s869_s24 = sphi %s928_s24, %s1117_s24  }
   0xa   : > { %p586_p0 = scmp.ge.s32.totalorder %s881_s27, 1  ;;  %p46_p1 = scmp.eq.s32.totalorder %s952_s8, 0 }
   0xb   : > { %p208_p2 = scmp.lt.s32.totalorder %s881_s27, 3  ;;  %s883_s10 = smov [#allocation5]  }
   0xc   : > { %s221_s11 = sshll.u32 %s883_s10, 4  ;;  %s236_s14 = sshll.u32 %s1103_s3, 4  ;;  %s222_s11 = int_to_ptr.vmem [resolvable:$true] %s221_s11  ;;  %s237_s14 = int_to_ptr.hbm [resolvable:$true] %s236_s14 }
   0xd   : > { %p957_p3 = pnand %p586_p0, %p208_p2  ;;  %s253_s18 = sshll.u32 %s1105_s5, 4  ;;  %s254_s18 = int_to_ptr.hbm [resolvable:$true] %s253_s18 }
   0xe   : > { %s884_s19 = smov [#allocation7]   ;;  %s885_s21 = smov 128  }
   0xf   : > { %s219_s30 = sshll.u32 %s1109_s1, 4  ;;  %p619_p4 = pneg %p957_p3  ;;  %s220_s30 = int_to_ptr.hbm [resolvable:$true] %s219_s30 }
  0x10   : > { %s238_s20 = sshll.u32 %s884_s19, 4  ;;  %s886_s22 = smov 8   ;;  %s239_s20 = int_to_ptr.vmem [resolvable:$true] %s238_s20 }
  0x11   : > { %p969_p6 = pnand %p619_p4, %p46_p1  ;;  %s887_s23 = smov [#allocation8]  }
  0x12   : > { %s255_s28 = sshll.u32 %s887_s23, 4  ;;  %s585_s29 = sadd.s32 4294967294, %s881_s27   ;;  %s256_s28 = int_to_ptr.vmem [resolvable:$true] %s255_s28 }
  0x13   : > { %622 = dma.hbm_to_vmem [thread:$0]  (!%p969_p6), %s220_s30, 2048, %s222_s11, [#allocation6], %s885_s21, %s885_s21, %s886_s22  }
  0x14   : > { %625 = dma.hbm_to_vmem [thread:$0]  (!%p969_p6), %s237_s14, 2048, %s239_s20, [#allocation6], %s885_s21, %s885_s21, %s886_s22  }
  0x15   : > { %628 = dma.hbm_to_vmem [thread:$0]  (!%p969_p6), %s254_s18, 2048, %s256_s28, [#allocation9], %s885_s21, %s885_s21, %s886_s22  }
  0x16   : > { %s984_s10 = sadd.s32 1, %s881_s27   ;;  %s32_s12 = sadd.s32 1, %s877_s26 }
  0x17   : > { %s29_s30 = ssub.s32 %s881_s27, %s984_s10  ;;  %p39_p7 = scmp.ne.s32.totalorder %s877_s26, %s873_s25 }
  0x18   : > { %p30_p8 = scmp.eq.s32.totalorder %s29_s30, 0  ;;  %p40_p9 = scmp.eq.s32.totalorder %s881_s27, 0 }
  0x19   : > { %p45_p10 = scmp.ne.s32.totalorder %s873_s25, %s869_s24  ;;  %p195_p11 = scmp.eq.s32.totalorder %s952_s8, 1 }
  0x1a   : > { %s996_s11 = scalar_select %p30_p8, %s877_s26, %s32_s12  }
  0x1b   : > { %p1000_p12 = por %p46_p1, %p45_p10  ;;  %p1004_p13 = por %p195_p11, %p39_p7 }
  0x1c   : > { %p201_p0 = scmp.eq.s32.totalorder %s585_s29, 1  ;;  %p41_p2 = por %p40_p9, %p39_p7 }
  0x1d   : > { %s272_s15 = sand.u32 1, %s877_s26   ;;  %p640_p6 = scmp.lt.s32.totalorder %s881_s27, 2 }
  0x1e   : > { %p1009_p4 = por %p201_p0, %p45_p10  ;;  %s591_s17 = sshll.u32 %s272_s15, 3 }
  0x1f   : > { %s592_s18 = sshll.u32 %s881_s27, 3  ;;  %s276_s23 = scalar_lea.vmem [#allocation2], %s591_s17 }
  0x20   : > { %s280_s21 = scalar_lea.hbm %s1100_s0, %s592_s18  ;;  %s284_s28 = sshll.u32 %s276_s23, 4  ;;  %s285_s28 = int_to_ptr.vmem [resolvable:$true] %s284_s28 }
  0x21   : > { %s282_s22 = sshll.u32 %s280_s21, 4  ;;  %p1018_p8 = pnand %p640_p6, %p41_p2  ;;  %s283_s22 = int_to_ptr.hbm [resolvable:$true] %s282_s22 }
  0x22   : > { %s273_s12 = scalar_lea.sflag [#allocation3], %s272_s15  ;;  %s777_s30 = sshra.s32 %s283_s22, 4  ;;  %s778_s30 = int_to_ptr.hbm [resolvable:$true] %s777_s30 }
  0x23   : > { %s779_s1 = scalar_lea.hbm %s778_s30, 8  ;;  %p781_p9 = pneg %p1018_p8 }
  0x24   : > { %p780_p7 = scmp.ne.s32.totalorder %s778_s30, %s779_s1  ;;  %s784_s17 = scalar_lea.hbm %s1100_s0, 16 }
  0x25   : > { %p785_p0 = scmp.lt.s32.totalorder %s778_s30, %s1100_s0  ;;  %p786_p2 = scmp.lt.s32.totalorder %s784_s17, %s779_s1 }
  0x26   : > { %p782_p10 = pnand %p781_p9, %p780_p7 }
  0x27   : > { %p787_p6 = por %p786_p2, %p785_p0 }
  0x28   : > { %p783_p11 = pneg %p782_p10 }
  0x2a   : > { %p788_p5 = pnand %p787_p6, %p783_p11 }
  0x2c   : > { %791 = shalt.err (!%p788_p5)
}
  0x2d   : > { %632 = dma.hbm_to_vmem [thread:$0]  (!%p1018_p8), %s283_s22, 128, %s285_s28, %s273_s12  }
  0x2e   : > { %293 = sbr.rel (%p957_p3) target bundleno = 490 (0x1ea), region = 48  ;;  %s1035_s15 = sand.u32 (!%p957_p3), 1, %s873_s25  }
  0x2f   : > { %s594_s23 = sshll.u32 (!%p957_p3), %s1035_s15, 3  ;;  %s296_s18 = scalar_lea.sflag (!%p957_p3), [#allocation3], %s1035_s15 }
  0x30   : > { %s1041_s1 = scalar_lea.vmem (!%p957_p3), [#allocation2], %s594_s23 }
  0x33   : > { %852 = dma.done.wait (%p1000_p12), %s296_s18, 128  }
  0x34   : > { %854 = vsyncadd (%p1000_p12), %s296_s18, 4294967168 }
  0x35   : > { %856 = dma.done.wait (%p46_p1), [#allocation6], 4096  }
  0x36   : > { %858 = vsyncadd (%p46_p1), [#allocation6], 4294963200 }
  0x37   : > { %860 = dma.done.wait (%p46_p1), [#allocation9], 2048  }
  0x38   : > { %862 = vsyncadd (%p46_p1), [#allocation9], 4294965248  ;;  %v362_v0 = vld [vmem:[#allocation5 + $0x78] sm:$0xff]  ;;  %v361_v1 = vld [vmem:[#allocation5 + $0x70] sm:$0xff]  ;;  %s600_s29 = sshll.u32 %s952_s8, 3  ;;  %s345_s21 = scalar_lea.vmem [#allocation10], %s594_s23 }
  0x39   : > { %367 = vmatpush.msra.mxu0 %v362_v0  ;;  %v360_v2 = vld [vmem:[#allocation5 + $0x68] sm:$0xff]  ;;  %v359_v3 = vld [vmem:[#allocation5 + $0x60] sm:$0xff]  ;;  %v403_v4 = vld [vmem:[#allocation7 + $0x78] sm:$0xff]  ;;  %s481_s19 = scalar_lea.hbm %s1107_s7, %s600_s29  ;;  %s483_s18 = sshll.u32 %s345_s21, 4  ;;  %s484_s18 = int_to_ptr.vmem [resolvable:$true] %s483_s18 }
  0x3a   : > { %v358_v5 = vld [vmem:[#allocation5 + $0x58] sm:$0xff]  ;;  %408 = vmatpush.msra.mxu1 %v403_v4  ;;  %v402_v6 = vld [vmem:[#allocation7 + $0x70] sm:$0xff]  ;;  %v401_v7 = vld [vmem:[#allocation7 + $0x68] sm:$0xff]  ;;  %s471_s9 = scalar_lea.sflag [#allocation4], %s1035_s15  ;;  %s827_s29 = scalar_lea.hbm %s1107_s7, 16 }
  0x3b   : > { %368 = vmatpush.msra.mxu0 %v361_v1  ;;  %v357_v8 = vld [vmem:[#allocation5 + $0x50] sm:$0xff]  ;;  %v400_v9 = vld [vmem:[#allocation7 + $0x60] sm:$0xff]  ;;  %v356_v10 = vld [vmem:[#allocation5 + $0x48] sm:$0xff] }
  0x3c   : > { %409 = vmatpush.msra.mxu1 %v402_v6  ;;  %v399_v11 = vld [vmem:[#allocation7 + $0x58] sm:$0xff]  ;;  %v355_v12 = vld [vmem:[#allocation5 + $0x40] sm:$0xff]  ;;  %v398_v13 = vld [vmem:[#allocation7 + $0x50] sm:$0xff] }
  0x3d   : > { %369 = vmatpush.msra.mxu0 %v360_v2  ;;  %v354_v14 = vld [vmem:[#allocation5 + $0x38] sm:$0xff]  ;;  %v397_v15 = vld [vmem:[#allocation7 + $0x48] sm:$0xff]  ;;  %v353_v16 = vld [vmem:[#allocation5 + $0x30] sm:$0xff] }
  0x3e   : > { %410 = vmatpush.msra.mxu1 %v401_v7  ;;  %v396_v17 = vld [vmem:[#allocation7 + $0x40] sm:$0xff]  ;;  %v352_v18 = vld [vmem:[#allocation5 + $0x28] sm:$0xff]  ;;  %v395_v19 = vld [vmem:[#allocation7 + $0x38] sm:$0xff] }
  0x3f   : > { %370 = vmatpush.msra.mxu0 %v359_v3  ;;  %v351_v20 = vld [vmem:[#allocation5 + $0x20] sm:$0xff]  ;;  %v394_v21 = vld [vmem:[#allocation7 + $0x30] sm:$0xff]  ;;  %v350_v22 = vld [vmem:[#allocation5 + $0x18] sm:$0xff] }
  0x40   : > { %411 = vmatpush.msra.mxu1 %v400_v9  ;;  %v393_v23 = vld [vmem:[#allocation7 + $0x28] sm:$0xff]  ;;  %v349_v24 = vld [vmem:[#allocation5 + $0x10] sm:$0xff]  ;;  %v392_v25 = vld [vmem:[#allocation7 + $0x20] sm:$0xff] }
  0x41   : > { %371 = vmatpush.msra.mxu0 %v358_v5  ;;  %v348_v26 = vld [vmem:[#allocation5 + $0x8] sm:$0xff]  ;;  %v391_v27 = vld [vmem:[#allocation7 + $0x18] sm:$0xff]  ;;  %v347_v28 = vld [vmem:[#allocation5] sm:$0xff] }
  0x42   : > { %412 = vmatpush.msra.mxu1 %v399_v11  ;;  %v346_v29 = vld [vmem:[%s1041_s1] sm:$0xff]  ;;  %v389_v31 = vld [vmem:[#allocation7 + $0x8] sm:$0xff]  ;;  %v388_v32 = vld [vmem:[#allocation7] sm:$0xff]  ;;  %s485_s1 = sshll.u32 %s481_s19, 4  ;;  %s486_s1 = int_to_ptr.hbm [resolvable:$true] %s485_s1 }
  0x43   : > { %372 = vmatpush.msra.mxu0 %v357_v8  ;;  %v390_v30 = vld [vmem:[#allocation7 + $0x10] sm:$0xff]  ;;  %v444_v33 = vld [vmem:[#allocation8 + $0x78] sm:$0xff]  ;;  %v442_v35 = vld [vmem:[#allocation8 + $0x68] sm:$0xff]  ;;  %s821_s8 = sshra.s32 %s486_s1, 4  ;;  %s822_s8 = int_to_ptr.hbm [resolvable:$true] %s821_s8 }
  0x44   : > { %413 = vmatpush.msra.mxu1 %v398_v13  ;;  %v443_v34 = vld [vmem:[#allocation8 + $0x70] sm:$0xff]  ;;  %449 = vmatpush.msra.mxu2 %v444_v33  ;;  %v441_v36 = vld [vmem:[#allocation8 + $0x60] sm:$0xff]  ;;  %v440_v37 = vld [vmem:[#allocation8 + $0x58] sm:$0xff]  ;;  %s823_s13 = scalar_lea.hbm %s822_s8, 8  ;;  %p828_p12 = scmp.lt.s32.totalorder %s822_s8, %s1107_s7 }
  0x45   : > { %373 = vmatpush.msra.mxu0 %v356_v10  ;;  %v439_v38 = vld [vmem:[#allocation8 + $0x50] sm:$0xff]  ;;  %v438_v39 = vld [vmem:[#allocation8 + $0x48] sm:$0xff]  ;;  %v437_v40 = vld [vmem:[#allocation8 + $0x40] sm:$0xff]  ;;  %p824_p1 = scmp.ne.s32.totalorder %s822_s8, %s823_s13  ;;  %p829_p8 = scmp.lt.s32.totalorder %s827_s29, %s823_s13 }
  0x46   : > { %414 = vmatpush.msra.mxu1 %v397_v15  ;;  %450 = vmatpush.msra.mxu2 %v443_v34  ;;  %v436_v41 = vld [vmem:[#allocation8 + $0x38] sm:$0xff]  ;;  %v435_v42 = vld [vmem:[#allocation8 + $0x30] sm:$0xff]  ;;  %v434_v43 = vld [vmem:[#allocation8 + $0x28] sm:$0xff] }
  0x47   : > { %374 = vmatpush.msra.mxu0 %v355_v12  ;;  %v682_v44 = vld [vmem:[%s1102_s2] ss:$0 sm:$0xff]  ;;  %v433_v48 = vld [vmem:[#allocation8 + $0x20] sm:$0xff]  ;;  %v432_v49 = vld [vmem:[#allocation8 + $0x18] sm:$0xff]  ;;  %p825_p3 = pnand %p824_p1, %p1004_p13  ;;  %p830_p7 = por %p829_p8, %p828_p12 }
  0x48   : > { %415 = vmatpush.msra.mxu1 %v396_v17  ;;  %451 = vmatpush.msra.mxu2 %v442_v35  ;;  %v431_v50 = vld [vmem:[#allocation8 + $0x10] sm:$0xff]  ;;  %v430_v51 = vld [vmem:[#allocation8 + $0x8] sm:$0xff]  ;;  %v429_v52 = vld [vmem:[#allocation8] sm:$0xff] }
  0x49   : > { %375 = vmatpush.msra.mxu0 %v354_v14  ;;  %v683_v53 = vld [vmem:[%s1104_s4] ss:$0 sm:$0xff]  ;;  %p826_p5 = pneg %p825_p3 }
  0x4a   : > { %416 = vmatpush.msra.mxu1 %v395_v19  ;;  %452 = vmatpush.msra.mxu2 %v441_v36  ;;  %v684_v57 = vld [vmem:[%s1106_s6] ss:$0 sm:$0xff] }
  0x4b   : > { %376 = vmatpush.msra.mxu0 %v353_v16  ;;  %p831_p9 = pnand %p830_p7, %p826_p5 }
  0x4c   : > { %417 = vmatpush.msra.mxu1 %v394_v21  ;;  %453 = vmatpush.msra.mxu2 %v440_v37 }
  0x4d   : > { %377 = vmatpush.msra.mxu0 %v352_v18 }
  0x4e   : > { %418 = vmatpush.msra.mxu1 %v393_v23  ;;  %454 = vmatpush.msra.mxu2 %v439_v38 }
  0x4f   : > { %378 = vmatpush.msra.mxu0 %v351_v20 }
  0x50   : > { %419 = vmatpush.msra.mxu1 %v392_v25  ;;  %455 = vmatpush.msra.mxu2 %v438_v39 }
  0x51   : > { %379 = vmatpush.msra.mxu0 %v350_v22 }
  0x52   : > { %420 = vmatpush.msra.mxu1 %v391_v27  ;;  %456 = vmatpush.msra.mxu2 %v437_v40 }
  0x53   : > { %380 = vmatpush.msra.mxu0 %v349_v24 }
  0x54   : > { %421 = vmatpush.msra.mxu1 %v390_v30  ;;  %457 = vmatpush.msra.mxu2 %v436_v41 }
  0x55   : > { %381 = vmatpush.msra.mxu0 %v348_v26 }
  0x56   : > { %422 = vmatpush.msra.mxu1 %v389_v31  ;;  %458 = vmatpush.msra.mxu2 %v435_v42 }
  0x57   : > { %382 = vmatpush.msra.mxu0 %v347_v28 }
  0x58   : > { %383 = vmatmul.f32.vlgmr.msra.gmra.mxu0 %v346_v29  ;;  %423 = vmatpush.msra.mxu1 %v388_v32 }
  0x59   : > { %459 = vmatpush.msra.mxu2 %v434_v43 }
  0x5b   : > { %460 = vmatpush.msra.mxu2 %v433_v48 }
  0x5d   : > { %461 = vmatpush.msra.mxu2 %v432_v49 }
  0x5f   : > { %462 = vmatpush.msra.mxu2 %v431_v50 }
  0x61   : > { %463 = vmatpush.msra.mxu2 %v430_v51 }
  0x63   : > { %464 = vmatpush.msra.mxu2 %v429_v52 }
  0xd5   : > { %v384_v45 = vpop.f32.mrf.mxu0 }
  0xd6   : > { %v385_v46 = vadd.f32 %v682_v44, %v384_v45 }
  0xd8   : > { %v387_v47 = vmax.f32 %v385_v46, 0.0 }
  0xda   : > { %424 = vmatmul.f32.vlgmr.msra.gmra.mxu1 %v387_v47 }
 0x157   : > { %v425_v54 = vpop.f32.mrf.mxu1 }
 0x158   : > { %v426_v55 = vadd.f32 %v683_v53, %v425_v54 }
 0x15a   : > { %685 = vtanh.f32 %v426_v55 }
 0x160   : > { %v686_v56 = vpop.eup %685 }
 0x161   : > { %465 = vmatmul.f32.vlgmr.msra.gmra.mxu2 %v686_v56 }
 0x1e4   : > { %v466_v58 = vpop.f32.mrf.mxu2 }
 0x1e5   : > { %v467_v59 = vadd.f32 %v684_v57, %v466_v58 }
 0x1e7   : > { %469 = vst [vmem:[%s345_s21] sm:$0xff] %v467_v59 }
 0x1e8   : > { %834 = shalt.err (!%p831_p9)
}
 0x1e9   : > { %617 = dma.vmem_to_hbm [thread:$0]  (%p1004_p13), %s484_s18, 128, %s486_s1, %s471_s9  }
 0x1ea PF: > { %s497_s15 = sand.u32 1, %s869_s24   ;;  %p1116_p10 = scmp.ge.s32.totalorder %s881_s27, 2 }
 0x1eb   : > { %s498_s30 = scalar_lea.sflag [#allocation4], %s497_s15 }
 0x1ec   : > { %p634_p11 = pnand %p1116_p10, %p1009_p4 }
 0x1ee   : > { %p635_p0 = pneg %p634_p11 }
 0x1f0   : > { %864 = dma.done.wait (%p635_p0), %s498_s30, 128  }
 0x1f1   : > { %866 = vsyncadd (%p635_p0), %s498_s30, 4294967168  ;;  %p22_p2 = scmp.ge.s32.totalorder %s984_s10, 4   ;;  %s1117_s24 = smov %s873_s25 }
 0x1f2   : > { %s1118_s25 = smov %s877_s26  ;;  %s1119_s26 = smov %s996_s11 }
 0x1f3   : > { %s1120_s27 = smov %s984_s10  ;;  %24 = sbr.rel (!%p22_p2) target bundleno = 9 (0x9), region = 105 }
 0x1f8   :  { %504 = vsyncpa [#allocation3], 1 }
 0x1f9   :  { %506 = vsyncpa [#allocation3 + $0x1], 1 }
 0x1fa   :  { %507 = vsyncpa [#allocation6], 1 }
 0x1fb   :  { %508 = vsyncpa [#allocation9], 1 }
 0x1fc   :  { %509 = vsyncpa [#allocation4], 1 }
 0x1fd   :  { %511 = vsyncpa [#allocation4 + $0x1], 1 }

// kernel: tpu_custom_call.1
= control target key start
LH: loop header
LB: loop body
LE: loop exit
PB: predicated region body
PF: predicated region fallthrough
CT: control target
= control target key end

     0   :  { %s1100_s0 = inlined_call_operand.hbm [shape: f32[16,128], index: 0, kind: input, shape index: {}]   ;;  %s1101_s1 = inlined_call_operand.hbm [shape: f32[128,128], index: 1, kind: input, shape index: {}]   ;;  %s1102_s2 = inlined_call_operand.vmem [shape: f32[1,128], index: 2, kind: input, shape index: {}]   ;;  %s1103_s3 = inlined_call_operand.hbm [shape: f32[128,128], index: 3, kind: input, shape index: {}]   ;;  %s1104_s4 = inlined_call_operand.vmem [shape: f32[1,128], index: 4, kind: input, shape index: {}]   ;;  %s1105_s5 = inlined_call_operand.hbm [shape: f32[128,128], index: 5, kind: input, shape index: {}]   ;;  %s1106_s6 = inlined_call_operand.vmem [shape: f32[1,128], index: 6, kind: input, shape index: {}]   ;;  %s1107_s7 = inlined_call_operand.hbm [shape: f32[16,128], index: 7, kind: output, shape index: {}]  }
   0x1   :  { %1108 = sst [smem:[#allocation15_spill]] %s1101_s1 }
   0x2   :  { %12 = vsyncpa [#allocation3], 0 }
   0x3   :  { %14 = vsyncpa [#allocation3 + $0x1], 0 }
   0x4   :  { %15 = vsyncpa [#allocation6], 0 }
   0x5   :  { %16 = vsyncpa [#allocation9], 0 }
   0x6   :  { %17 = vsyncpa [#allocation4], 0 }
   0x7   :  { %19 = vsyncpa [#allocation4 + $0x1], 0  ;;  %s928_s24 = smov 0   ;;  %s930_s25 = smov 0  }
   0x8   :  { %s932_s26 = smov 0   ;;  %s934_s27 = smov 0  }
   0x9 LB: > { %s1109_s1 = sld [smem:[#allocation15_spill]]  ;;  %s952_s8 = sadd.s32 4294967295, %s881_s27   ;;  %s881_s27 = sphi %s934_s27, %s1120_s27   ;;  %s877_s26 = sphi %s932_s26, %s1119_s26   ;;  %s873_s25 = sphi %s930_s25, %s1118_s25   ;;  %s869_s24 = sphi %s928_s24, %s1117_s24  }
   0xa   : > { %p586_p0 = scmp.ge.s32.totalorder %s881_s27, 1  ;;  %p46_p1 = scmp.eq.s32.totalorder %s952_s8, 0 }
   0xb   : > { %p208_p2 = scmp.lt.s32.totalorder %s881_s27, 3  ;;  %s883_s10 = smov [#allocation5]  }
   0xc   : > { %s221_s11 = sshll.u32 %s883_s10, 4  ;;  %s236_s14 = sshll.u32 %s1103_s3, 4  ;;  %s222_s11 = int_to_ptr.vmem [resolvable:$true] %s221_s11  ;;  %s237_s14 = int_to_ptr.hbm [resolvable:$true] %s236_s14 }
   0xd   : > { %p957_p3 = pnand %p586_p0, %p208_p2  ;;  %s253_s18 = sshll.u32 %s1105_s5, 4  ;;  %s254_s18 = int_to_ptr.hbm [resolvable:$true] %s253_s18 }
   0xe   : > { %s884_s19 = smov [#allocation7]   ;;  %s885_s21 = smov 128  }
   0xf   : > { %s219_s30 = sshll.u32 %s1109_s1, 4  ;;  %p619_p4 = pneg %p957_p3  ;;  %s220_s30 = int_to_ptr.hbm [resolvable:$true] %s219_s30 }
  0x10   : > { %s238_s20 = sshll.u32 %s884_s19, 4  ;;  %s886_s22 = smov 8   ;;  %s239_s20 = int_to_ptr.vmem [resolvable:$true] %s238_s20 }
  0x11   : > { %p969_p6 = pnand %p619_p4, %p46_p1  ;;  %s887_s23 = smov [#allocation8]  }
  0x12   : > { %s255_s28 = sshll.u32 %s887_s23, 4  ;;  %s585_s29 = sadd.s32 4294967294, %s881_s27   ;;  %s256_s28 = int_to_ptr.vmem [resolvable:$true] %s255_s28 }
  0x13   : > { %622 = dma.hbm_to_vmem [thread:$0]  (!%p969_p6), %s220_s30, 2048, %s222_s11, [#allocation6], %s885_s21, %s885_s21, %s886_s22  }
  0x14   : > { %625 = dma.hbm_to_vmem [thread:$0]  (!%p969_p6), %s237_s14, 2048, %s239_s20, [#allocation6], %s885_s21, %s885_s21, %s886_s22  }
  0x15   : > { %628 = dma.hbm_to_vmem [thread:$0]  (!%p969_p6), %s254_s18, 2048, %s256_s28, [#allocation9], %s885_s21, %s885_s21, %s886_s22  }
  0x16   : > { %s984_s10 = sadd.s32 1, %s881_s27   ;;  %s32_s12 = sadd.s32 1, %s877_s26 }
  0x17   : > { %s29_s30 = ssub.s32 %s881_s27, %s984_s10  ;;  %p39_p7 = scmp.ne.s32.totalorder %s877_s26, %s873_s25 }
  0x18   : > { %p30_p8 = scmp.eq.s32.totalorder %s29_s30, 0  ;;  %p40_p9 = scmp.eq.s32.totalorder %s881_s27, 0 }
  0x19   : > { %p45_p10 = scmp.ne.s32.totalorder %s873_s25, %s869_s24  ;;  %p195_p11 = scmp.eq.s32.totalorder %s952_s8, 1 }
  0x1a   : > { %s996_s11 = scalar_select %p30_p8, %s877_s26, %s32_s12  }
  0x1b   : > { %p1000_p12 = por %p46_p1, %p45_p10  ;;  %p1004_p13 = por %p195_p11, %p39_p7 }
  0x1c   : > { %p201_p0 = scmp.eq.s32.totalorder %s585_s29, 1  ;;  %p41_p2 = por %p40_p9, %p39_p7 }
  0x1d   : > { %s272_s15 = sand.u32 1, %s877_s26   ;;  %p640_p6 = scmp.lt.s32.totalorder %s881_s27, 2 }
  0x1e   : > { %p1009_p4 = por %p201_p0, %p45_p10  ;;  %s591_s17 = sshll.u32 %s272_s15, 3 }
  0x1f   : > { %s592_s18 = sshll.u32 %s881_s27, 3  ;;  %s276_s23 = scalar_lea.vmem [#allocation2], %s591_s17 }
  0x20   : > { %s280_s21 = scalar_lea.hbm %s1100_s0, %s592_s18  ;;  %s284_s28 = sshll.u32 %s276_s23, 4  ;;  %s285_s28 = int_to_ptr.vmem [resolvable:$true] %s284_s28 }
  0x21   : > { %s282_s22 = sshll.u32 %s280_s21, 4  ;;  %p1018_p8 = pnand %p640_p6, %p41_p2  ;;  %s283_s22 = int_to_ptr.hbm [resolvable:$true] %s282_s22 }
  0x22   : > { %s273_s12 = scalar_lea.sflag [#allocation3], %s272_s15  ;;  %s777_s30 = sshra.s32 %s283_s22, 4  ;;  %s778_s30 = int_to_ptr.hbm [resolvable:$true] %s777_s30 }
  0x23   : > { %s779_s1 = scalar_lea.hbm %s778_s30, 8  ;;  %p781_p9 = pneg %p1018_p8 }
  0x24   : > { %p780_p7 = scmp.ne.s32.totalorder %s778_s30, %s779_s1  ;;  %s784_s17 = scalar_lea.hbm %s1100_s0, 16 }
  0x25   : > { %p785_p0 = scmp.lt.s32.totalorder %s778_s30, %s1100_s0  ;;  %p786_p2 = scmp.lt.s32.totalorder %s784_s17, %s779_s1 }
  0x26   : > { %p782_p10 = pnand %p781_p9, %p780_p7 }
  0x27   : > { %p787_p6 = por %p786_p2, %p785_p0 }
  0x28   : > { %p783_p11 = pneg %p782_p10 }
  0x2a   : > { %p788_p5 = pnand %p787_p6, %p783_p11 }
  0x2c   : > { %791 = shalt.err (!%p788_p5)
}
  0x2d   : > { %632 = dma.hbm_to_vmem [thread:$0]  (!%p1018_p8), %s283_s22, 128, %s285_s28, %s273_s12  }
  0x2e   : > { %293 = sbr.rel (%p957_p3) target bundleno = 490 (0x1ea), region = 48  ;;  %s1035_s15 = sand.u32 (!%p957_p3), 1, %s873_s25  }
  0x2f   : > { %s594_s23 = sshll.u32 (!%p957_p3), %s1035_s15, 3  ;;  %s296_s18 = scalar_lea.sflag (!%p957_p3), [#allocation3], %s1035_s15 }
  0x30   : > { %s1041_s1 = scalar_lea.vmem (!%p957_p3), [#allocation2], %s594_s23 }
  0x33   : > { %852 = dma.done.wait (%p1000_p12), %s296_s18, 128  }
  0x34   : > { %854 = vsyncadd (%p1000_p12), %s296_s18, 4294967168 }
  0x35   : > { %856 = dma.done.wait (%p46_p1), [#allocation6], 4096  }
  0x36   : > { %858 = vsyncadd (%p46_p1), [#allocation6], 4294963200 }
  0x37   : > { %860 = dma.done.wait (%p46_p1), [#allocation9], 2048  }
  0x38   : > { %862 = vsyncadd (%p46_p1), [#allocation9], 4294965248  ;;  %v362_v0 = vld [vmem:[#allocation5 + $0x78] sm:$0xff]  ;;  %v361_v1 = vld [vmem:[#allocation5 + $0x70] sm:$0xff]  ;;  %s600_s29 = sshll.u32 %s952_s8, 3  ;;  %s345_s21 = scalar_lea.vmem [#allocation10], %s594_s23 }
  0x39   : > { %367 = vmatpush.msra.mxu0 %v362_v0  ;;  %v360_v2 = vld [vmem:[#allocation5 + $0x68] sm:$0xff]  ;;  %v359_v3 = vld [vmem:[#allocation5 + $0x60] sm:$0xff]  ;;  %v403_v4 = vld [vmem:[#allocation7 + $0x78] sm:$0xff]  ;;  %s481_s19 = scalar_lea.hbm %s1107_s7, %s600_s29  ;;  %s483_s18 = sshll.u32 %s345_s21, 4  ;;  %s484_s18 = int_to_ptr.vmem [resolvable:$true] %s483_s18 }
  0x3a   : > { %v358_v5 = vld [vmem:[#allocation5 + $0x58] sm:$0xff]  ;;  %408 = vmatpush.msra.mxu1 %v403_v4  ;;  %v402_v6 = vld [vmem:[#allocation7 + $0x70] sm:$0xff]  ;;  %v401_v7 = vld [vmem:[#allocation7 + $0x68] sm:$0xff]  ;;  %s471_s9 = scalar_lea.sflag [#allocation4], %s1035_s15  ;;  %s827_s29 = scalar_lea.hbm %s1107_s7, 16 }
  0x3b   : > { %368 = vmatpush.msra.mxu0 %v361_v1  ;;  %v357_v8 = vld [vmem:[#allocation5 + $0x50] sm:$0xff]  ;;  %v400_v9 = vld [vmem:[#allocation7 + $0x60] sm:$0xff]  ;;  %v356_v10 = vld [vmem:[#allocation5 + $0x48] sm:$0xff] }
  0x3c   : > { %409 = vmatpush.msra.mxu1 %v402_v6  ;;  %v399_v11 = vld [vmem:[#allocation7 + $0x58] sm:$0xff]  ;;  %v355_v12 = vld [vmem:[#allocation5 + $0x40] sm:$0xff]  ;;  %v398_v13 = vld [vmem:[#allocation7 + $0x50] sm:$0xff] }
  0x3d   : > { %369 = vmatpush.msra.mxu0 %v360_v2  ;;  %v354_v14 = vld [vmem:[#allocation5 + $0x38] sm:$0xff]  ;;  %v397_v15 = vld [vmem:[#allocation7 + $0x48] sm:$0xff]  ;;  %v353_v16 = vld [vmem:[#allocation5 + $0x30] sm:$0xff] }
  0x3e   : > { %410 = vmatpush.msra.mxu1 %v401_v7  ;;  %v396_v17 = vld [vmem:[#allocation7 + $0x40] sm:$0xff]  ;;  %v352_v18 = vld [vmem:[#allocation5 + $0x28] sm:$0xff]  ;;  %v395_v19 = vld [vmem:[#allocation7 + $0x38] sm:$0xff] }
  0x3f   : > { %370 = vmatpush.msra.mxu0 %v359_v3  ;;  %v351_v20 = vld [vmem:[#allocation5 + $0x20] sm:$0xff]  ;;  %v394_v21 = vld [vmem:[#allocation7 + $0x30] sm:$0xff]  ;;  %v350_v22 = vld [vmem:[#allocation5 + $0x18] sm:$0xff] }
  0x40   : > { %411 = vmatpush.msra.mxu1 %v400_v9  ;;  %v393_v23 = vld [vmem:[#allocation7 + $0x28] sm:$0xff]  ;;  %v349_v24 = vld [vmem:[#allocation5 + $0x10] sm:$0xff]  ;;  %v392_v25 = vld [vmem:[#allocation7 + $0x20] sm:$0xff] }
  0x41   : > { %371 = vmatpush.msra.mxu0 %v358_v5  ;;  %v348_v26 = vld [vmem:[#allocation5 + $0x8] sm:$0xff]  ;;  %v391_v27 = vld [vmem:[#allocation7 + $0x18] sm:$0xff]  ;;  %v347_v28 = vld [vmem:[#allocation5] sm:$0xff] }
  0x42   : > { %412 = vmatpush.msra.mxu1 %v399_v11  ;;  %v346_v29 = vld [vmem:[%s1041_s1] sm:$0xff]  ;;  %v389_v31 = vld [vmem:[#allocation7 + $0x8] sm:$0xff]  ;;  %v388_v32 = vld [vmem:[#allocation7] sm:$0xff]  ;;  %s485_s1 = sshll.u32 %s481_s19, 4  ;;  %s486_s1 = int_to_ptr.hbm [resolvable:$true] %s485_s1 }
  0x43   : > { %372 = vmatpush.msra.mxu0 %v357_v8  ;;  %v390_v30 = vld [vmem:[#allocation7 + $0x10] sm:$0xff]  ;;  %v444_v33 = vld [vmem:[#allocation8 + $0x78] sm:$0xff]  ;;  %v442_v35 = vld [vmem:[#allocation8 + $0x68] sm:$0xff]  ;;  %s821_s8 = sshra.s32 %s486_s1, 4  ;;  %s822_s8 = int_to_ptr.hbm [resolvable:$true] %s821_s8 }
  0x44   : > { %413 = vmatpush.msra.mxu1 %v398_v13  ;;  %v443_v34 = vld [vmem:[#allocation8 + $0x70] sm:$0xff]  ;;  %449 = vmatpush.msra.mxu2 %v444_v33  ;;  %v441_v36 = vld [vmem:[#allocation8 + $0x60] sm:$0xff]  ;;  %v440_v37 = vld [vmem:[#allocation8 + $0x58] sm:$0xff]  ;;  %s823_s13 = scalar_lea.hbm %s822_s8, 8  ;;  %p828_p12 = scmp.lt.s32.totalorder %s822_s8, %s1107_s7 }
  0x45   : > { %373 = vmatpush.msra.mxu0 %v356_v10  ;;  %v439_v38 = vld [vmem:[#allocation8 + $0x50] sm:$0xff]  ;;  %v438_v39 = vld [vmem:[#allocation8 + $0x48] sm:$0xff]  ;;  %v437_v40 = vld [vmem:[#allocation8 + $0x40] sm:$0xff]  ;;  %p824_p1 = scmp.ne.s32.totalorder %s822_s8, %s823_s13  ;;  %p829_p8 = scmp.lt.s32.totalorder %s827_s29, %s823_s13 }
  0x46   : > { %414 = vmatpush.msra.mxu1 %v397_v15  ;;  %450 = vmatpush.msra.mxu2 %v443_v34  ;;  %v436_v41 = vld [vmem:[#allocation8 + $0x38] sm:$0xff]  ;;  %v435_v42 = vld [vmem:[#allocation8 + $0x30] sm:$0xff]  ;;  %v434_v43 = vld [vmem:[#allocation8 + $0x28] sm:$0xff] }
  0x47   : > { %374 = vmatpush.msra.mxu0 %v355_v12  ;;  %v682_v44 = vld [vmem:[%s1102_s2] ss:$0 sm:$0xff]  ;;  %v433_v48 = vld [vmem:[#allocation8 + $0x20] sm:$0xff]  ;;  %v432_v49 = vld [vmem:[#allocation8 + $0x18] sm:$0xff]  ;;  %p825_p3 = pnand %p824_p1, %p1004_p13  ;;  %p830_p7 = por %p829_p8, %p828_p12 }
  0x48   : > { %415 = vmatpush.msra.mxu1 %v396_v17  ;;  %451 = vmatpush.msra.mxu2 %v442_v35  ;;  %v431_v50 = vld [vmem:[#allocation8 + $0x10] sm:$0xff]  ;;  %v430_v51 = vld [vmem:[#allocation8 + $0x8] sm:$0xff]  ;;  %v429_v52 = vld [vmem:[#allocation8] sm:$0xff] }
  0x49   : > { %375 = vmatpush.msra.mxu0 %v354_v14  ;;  %v683_v53 = vld [vmem:[%s1104_s4] ss:$0 sm:$0xff]  ;;  %p826_p5 = pneg %p825_p3 }
  0x4a   : > { %416 = vmatpush.msra.mxu1 %v395_v19  ;;  %452 = vmatpush.msra.mxu2 %v441_v36  ;;  %v684_v57 = vld [vmem:[%s1106_s6] ss:$0 sm:$0xff] }
  0x4b   : > { %376 = vmatpush.msra.mxu0 %v353_v16  ;;  %p831_p9 = pnand %p830_p7, %p826_p5 }
  0x4c   : > { %417 = vmatpush.msra.mxu1 %v394_v21  ;;  %453 = vmatpush.msra.mxu2 %v440_v37 }
  0x4d   : > { %377 = vmatpush.msra.mxu0 %v352_v18 }
  0x4e   : > { %418 = vmatpush.msra.mxu1 %v393_v23  ;;  %454 = vmatpush.msra.mxu2 %v439_v38 }
  0x4f   : > { %378 = vmatpush.msra.mxu0 %v351_v20 }
  0x50   : > { %419 = vmatpush.msra.mxu1 %v392_v25  ;;  %455 = vmatpush.msra.mxu2 %v438_v39 }
  0x51   : > { %379 = vmatpush.msra.mxu0 %v350_v22 }
  0x52   : > { %420 = vmatpush.msra.mxu1 %v391_v27  ;;  %456 = vmatpush.msra.mxu2 %v437_v40 }
  0x53   : > { %380 = vmatpush.msra.mxu0 %v349_v24 }
  0x54   : > { %421 = vmatpush.msra.mxu1 %v390_v30  ;;  %457 = vmatpush.msra.mxu2 %v436_v41 }
  0x55   : > { %381 = vmatpush.msra.mxu0 %v348_v26 }
  0x56   : > { %422 = vmatpush.msra.mxu1 %v389_v31  ;;  %458 = vmatpush.msra.mxu2 %v435_v42 }
  0x57   : > { %382 = vmatpush.msra.mxu0 %v347_v28 }
  0x58   : > { %383 = vmatmul.f32.vlgmr.msra.gmra.mxu0 %v346_v29  ;;  %423 = vmatpush.msra.mxu1 %v388_v32 }
  0x59   : > { %459 = vmatpush.msra.mxu2 %v434_v43 }
  0x5b   : > { %460 = vmatpush.msra.mxu2 %v433_v48 }
  0x5d   : > { %461 = vmatpush.msra.mxu2 %v432_v49 }
  0x5f   : > { %462 = vmatpush.msra.mxu2 %v431_v50 }
  0x61   : > { %463 = vmatpush.msra.mxu2 %v430_v51 }
  0x63   : > { %464 = vmatpush.msra.mxu2 %v429_v52 }
  0xd5   : > { %v384_v45 = vpop.f32.mrf.mxu0 }
  0xd6   : > { %v385_v46 = vadd.f32 %v682_v44, %v384_v45 }
  0xd8   : > { %v387_v47 = vmax.f32 %v385_v46, 0.0 }
  0xda   : > { %424 = vmatmul.f32.vlgmr.msra.gmra.mxu1 %v387_v47 }
 0x157   : > { %v425_v54 = vpop.f32.mrf.mxu1 }
 0x158   : > { %v426_v55 = vadd.f32 %v683_v53, %v425_v54 }
 0x15a   : > { %685 = vtanh.f32 %v426_v55 }
 0x160   : > { %v686_v56 = vpop.eup %685 }
 0x161   : > { %465 = vmatmul.f32.vlgmr.msra.gmra.mxu2 %v686_v56 }
 0x1e4   : > { %v466_v58 = vpop.f32.mrf.mxu2 }
 0x1e5   : > { %v467_v59 = vadd.f32 %v684_v57, %v466_v58 }
 0x1e7   : > { %469 = vst [vmem:[%s345_s21] sm:$0xff] %v467_v59 }
 0x1e8   : > { %834 = shalt.err (!%p831_p9)
}
 0x1e9   : > { %617 = dma.vmem_to_hbm [thread:$0]  (%p1004_p13), %s484_s18, 128, %s486_s1, %s471_s9  }
 0x1ea PF: > { %s497_s15 = sand.u32 1, %s869_s24   ;;  %p1116_p10 = scmp.ge.s32.totalorder %s881_s27, 2 }
 0x1eb   : > { %s498_s30 = scalar_lea.sflag [#allocation4], %s497_s15 }
 0x1ec   : > { %p634_p11 = pnand %p1116_p10, %p1009_p4 }
 0x1ee   : > { %p635_p0 = pneg %p634_p11 }
 0x1f0   : > { %864 = dma.done.wait (%p635_p0), %s498_s30, 128  }
 0x1f1   : > { %866 = vsyncadd (%p635_p0), %s498_s30, 4294967168  ;;  %p22_p2 = scmp.ge.s32.totalorder %s984_s10, 4   ;;  %s1117_s24 = smov %s873_s25 }
 0x1f2   : > { %s1118_s25 = smov %s877_s26  ;;  %s1119_s26 = smov %s996_s11 }
 0x1f3   : > { %s1120_s27 = smov %s984_s10  ;;  %24 = sbr.rel (!%p22_p2) target bundleno = 9 (0x9), region = 105 }
 0x1f8   :  { %504 = vsyncpa [#allocation3], 1 }
 0x1f9   :  { %506 = vsyncpa [#allocation3 + $0x1], 1 }
 0x1fa   :  { %507 = vsyncpa [#allocation6], 1 }
 0x1fb   :  { %508 = vsyncpa [#allocation9], 1 }
 0x1fc   :  { %509 = vsyncpa [#allocation4], 1 }
 0x1fd   :  { %511 = vsyncpa [#allocation4 + $0x1], 1 }

</bundles_post_ra>
